<compile_context>
chip_gen: v7x
topology: tpu7x:2x2x1
jax: 0.10.0
libtpu: 0.0.40
codegen_flags: <defaults>
</compile_context>

<pallas_src>
import numpy as np
import jax
import jax.numpy as jnp
from jax import lax
from jax.experimental import pallas as pl
from jax.experimental.pallas import tpu as pltpu


def _round_up(x, m):
    return ((x + m - 1) // m) * m


def _tensorcores_per_chip():
    # v7x has 2 TensorCores per chip; v5e/v6e have 1. Only split small grids on multi-TC.
    try:
        kind = jax.devices()[0].device_kind.lower()
        return 2 if "v7" in kind else 1
    except Exception:
        return 1


def _vmem_capacity_bytes():
    try:
        return int(pltpu.get_tpu_info().vmem_capacity_bytes)
    except Exception:
        return 64 << 20  # conservative (v7x per-TC)


def qus_embedding_kernel(ids_ref, tbl_ref, b_ref, o_ref):
    # ids_ref: (TN, 1) int32 | tbl_ref: (Vp, Hp) bf16 (fused emb@W^T, zero-padded, resident)
    # b_ref:   (1, Hp) f32    | o_ref:   (TN, Hp) out_dtype
    ids = ids_ref[...]                                        # (TN, 1)
    tn = ids.shape[0]
    vp = tbl_ref.shape[0]

    # One-hot gather fused with the linear: (TN, Vp) @ (Vp, Hp) -> (TN, Hp), f32 accumulate.
    lane_ids = lax.broadcasted_iota(jnp.int32, (tn, vp), 1)
    onehot = (ids == lane_ids).astype(tbl_ref.dtype)          # 0/1 exact in bf16
    acc = jnp.dot(onehot, tbl_ref[...], preferred_element_type=jnp.float32)
    o_ref[...] = (acc + b_ref[...]).astype(o_ref.dtype)


def prepare_qus_embedding_params(emb_table, weight, bias, *, padding_idx=None,
                                 table_dtype=jnp.bfloat16):
    """One-time prep (NOT on the per-call path).

    emb_table: [V, E] f32, weight: [H, E] (torch Linear layout), bias: [H].
    Returns (fused_p [Vp, Hp] table_dtype, bias_p [1, Hp] f32, V, H).
    """
    V, E = emb_table.shape
    H = weight.shape[0]
    emb = emb_table.astype(jnp.float32)
    if padding_idx is not None:
        emb = emb.at[padding_idx].set(0.0)  # enforce nn.Embedding(padding_idx=...) semantics
    fused = jnp.dot(emb, weight.T.astype(jnp.float32),
                    preferred_element_type=jnp.float32)       # [V, H]
    Vp = _round_up(V, 128)
    Hp = _round_up(H, 128)
    fused_p = jnp.zeros((Vp, Hp), table_dtype).at[:V, :H].set(fused.astype(table_dtype))
    bias_p = jnp.zeros((1, Hp), jnp.float32).at[0, :H].set(
        bias.reshape(H).astype(jnp.float32))
    return fused_p, bias_p, V, H


def qus_embedding_map(qus, fused_p, bias_p, V, H, *, token_tile=256,
                      out_dtype=jnp.float32):
    """qus: int32 [B, L]; fused_p/bias_p from prepare_qus_embedding_params -> [B, L, H]."""
    B, L = qus.shape
    N = B * L
    Vp, Hp = fused_p.shape

    # Token tiling: big tiles; only split small inputs across grid steps on multi-TC chips.
    n_cores = _tensorcores_per_chip()
    tile = max(8, _round_up(min(max(token_tile, 8), max(pl.cdiv(N, n_cores), 1)), 8))
    n_tiles = pl.cdiv(N, tile)
    Np = n_tiles * tile

    # Pad the flat id vector with an out-of-range id: zero one-hot row -> bias, sliced off.
    ids = qus.reshape(N).astype(jnp.int32)
    ids = jnp.pad(ids, (0, Np - N), constant_values=Vp).reshape(Np, 1)

    # Explicit VMEM budget (table single-buffered, bias, ids/out double buffers, one-hot).
    out_itemsize = np.dtype(out_dtype).itemsize
    need = (Vp * Hp * fused_p.dtype.itemsize            # resident fused table (x1)
            + 2 * Hp * 4                                 # bias buffers
            + 2 * tile * 128 * 4                         # ids double buffer (lane-padded)
            + 2 * tile * Hp * out_itemsize               # output double buffer
            + tile * Vp * 2)                             # one-hot intermediate
    vmem_limit = int(min(_vmem_capacity_bytes(), max(2 * need + (8 << 20), 16 << 20)))

    def run(single_buffer_constants):
        const_kwargs = {"pipeline_mode": pl.Buffered(1)} if single_buffer_constants else {}
        grid_spec = pltpu.PrefetchScalarGridSpec(
            num_scalar_prefetch=0,
            grid=(n_tiles,),
            in_specs=[
                pl.BlockSpec((tile, 1), lambda i: (i, 0)),                   # token id tile
                pl.BlockSpec((Vp, Hp), lambda i: (0, 0), **const_kwargs),    # fused table
                pl.BlockSpec((1, Hp), lambda i: (0, 0), **const_kwargs),     # bias
            ],
            out_specs=pl.BlockSpec((tile, Hp), lambda i: (i, 0)),
        )
        out = pl.pallas_call(
            qus_embedding_kernel,
            out_shape=jax.ShapeDtypeStruct((Np, Hp), out_dtype),
            grid_spec=grid_spec,
            compiler_params=pltpu.CompilerParams(
                dimension_semantics=("parallel",),
                vmem_limit_bytes=vmem_limit),
        )(ids, fused_p, bias_p)
        return jax.block_until_ready(out)

    try:
        out_flat = run(True)
    except Exception:
        # Fallback if this Pallas version rejects pipeline_mode=pl.Buffered(1).
        out_flat = run(False)

    return out_flat[:N, :H].reshape(B, L, H)


if __name__ == "__main__":
    # Small, module-consistent shapes.
    word_size = 50            # vocabulary size (table has word_size + 1 rows; last = padding)
    embedding_dim = 32
    hidden_size = 64
    B, L = 2, 8

    key = jax.random.PRNGKey(0)
    k_emb, k_w, k_b, k_q = jax.random.split(key, 4)

    V = word_size + 1
    emb_table = jax.random.normal(k_emb, (V, embedding_dim), dtype=jnp.float32) * 0.1
    # nn.Linear(embedding_dim, hidden_size): weight is [H, E] (torch layout), bias [H].
    weight = jax.random.normal(k_w, (hidden_size, embedding_dim), dtype=jnp.float32) * 0.05
    bias = jax.random.normal(k_b, (hidden_size,), dtype=jnp.float32) * 0.01
    qus = jax.random.randint(k_q, (B, L), 0, V, dtype=jnp.int32)

    # One-time prep (hoisted out of the per-call path): fuse, zero padding row, pad, cast bf16.
    fused_p, bias_p, V_, H_ = prepare_qus_embedding_params(
        emb_table, weight, bias, padding_idx=word_size)
    fused_p, bias_p = jax.block_until_ready((fused_p, bias_p))

    out = qus_embedding_map(qus, fused_p, bias_p, V_, H_)
    out = jax.block_until_ready(out)

    # Reference 1 (tight): identical bf16-rounded fused table, gathered in f32.
    fused_q = fused_p[:V, :hidden_size].astype(jnp.float32)
    ref_tight = jnp.take(fused_q, qus, axis=0) + bias
    # Reference 2 (semantic, full-f32 module math): loose tolerance absorbs bf16 table rounding.
    emb0 = emb_table.at[word_size].set(0.0)
    ref_f32 = jnp.einsum("ble,eh->blh", jnp.take(emb0, qus, axis=0), weight.T) + bias

    assert out.shape == (B, L, hidden_size)
    assert jnp.allclose(out, ref_tight, atol=1e-5, rtol=1e-5), "mismatch vs bf16-table reference"
    assert jnp.allclose(out, ref_f32, atol=5e-3, rtol=5e-2), "mismatch vs f32 module reference"

    print("KERNEL_OK")
</pallas_src>

<mosaic_0001>
module attributes {stable_mosaic.version = 11 : i64} {
  func.func @qus_embedding_kernel(%arg0: i32, %arg1: memref<16x1xi32, #tpu.memory_space<vmem>>, %arg2: memref<128x128xbf16, #tpu.memory_space<vmem>>, %arg3: memref<1x128xf32, #tpu.memory_space<vmem>>, %arg4: memref<16x128xf32, #tpu.memory_space<vmem>>) attributes {dimension_semantics = [#tpu.dimension_semantics<parallel>], iteration_bounds = array<i64: 1>, scalar_prefetch = 0 : i64, scratch_operands = 0 : i64, tpu.core_type = #tpu.core_type<tc>, window_params = [{transform_indices = @transform_0, window_bounds = array<i64: 16, 1>}, {pipeline_mode = #tpu.pipeline_mode<synchronous>, transform_indices = @transform_1, window_bounds = array<i64: 128, 128>}, {pipeline_mode = #tpu.pipeline_mode<synchronous>, transform_indices = @transform_2, window_bounds = array<i64: 1, 128>}, {transform_indices = @transform_3, window_bounds = array<i64: 16, 128>}]} {
    %c0 = arith.constant 0 : index
    %c0_0 = arith.constant 0 : index
    %0 = vector.load %arg1[%c0, %c0_0] : memref<16x1xi32, #tpu.memory_space<vmem>>, vector<16x1xi32>
    %1 = tpu.iota {dimensions = array<i32: 1>} : vector<16x128xi32>
    %2 = vector.broadcast %0 : vector<16x1xi32> to vector<16x128xi32>
    %3 = arith.cmpi eq, %2, %1 : vector<16x128xi32>
    %4 = arith.extui %3 : vector<16x128xi1> to vector<16x128xi32>
    %5 = arith.sitofp %4 : vector<16x128xi32> to vector<16x128xf32>
    %6 = arith.truncf %5 : vector<16x128xf32> to vector<16x128xbf16>
    %c0_1 = arith.constant 0 : index
    %c0_2 = arith.constant 0 : index
    %7 = vector.load %arg2[%c0_1, %c0_2] : memref<128x128xbf16, #tpu.memory_space<vmem>>, vector<128x128xbf16>
    %cst = arith.constant dense<0.000000e+00> : vector<16x128xf32>
    %8 = tpu.matmul %6, %7, %cst {dimension_numbers = #tpu.dot_dimension_numbers<[1], [0], [0], [1], [0, 0, 1, 1], [], []>} : vector<16x128xbf16>, vector<128x128xbf16>, vector<16x128xf32> -> vector<16x128xf32>
    %c0_3 = arith.constant 0 : index
    %c0_4 = arith.constant 0 : index
    %9 = vector.load %arg3[%c0_3, %c0_4] : memref<1x128xf32, #tpu.memory_space<vmem>>, vector<1x128xf32>
    %10 = vector.broadcast %9 : vector<1x128xf32> to vector<16x128xf32>
    %11 = arith.addf %8, %10 : vector<16x128xf32>
    %c0_5 = arith.constant 0 : index
    %c0_6 = arith.constant 0 : index
    %12 = vector.load %arg4[%c0_5, %c0_6] : memref<16x128xf32, #tpu.memory_space<vmem>>, vector<16x128xf32>
    tpu.vector_store %arg4[%c0_5, %c0_6], %11 {strides = array<i32>} : memref<16x128xf32, #tpu.memory_space<vmem>>, vector<16x128xf32>,
    return
  }
  func.func @transform_0(%arg0: i32) -> (i32, i32) {
    %c0_i32 = arith.constant 0 : i32
    %c0_i32_0 = arith.constant 0 : i32
    return %arg0, %c0_i32 : i32, i32
  }
  func.func @transform_1(%arg0: i32) -> (i32, i32) {
    %c0_i32 = arith.constant 0 : i32
    %c0_i32_0 = arith.constant 0 : i32
    %c0_i32_1 = arith.constant 0 : i32
    return %c0_i32, %c0_i32_0 : i32, i32
  }
  func.func @transform_2(%arg0: i32) -> (i32, i32) {
    %c0_i32 = arith.constant 0 : i32
    %c0_i32_0 = arith.constant 0 : i32
    %c0_i32_1 = arith.constant 0 : i32
    return %c0_i32, %c0_i32_0 : i32, i32
  }
  func.func @transform_3(%arg0: i32) -> (i32, i32) {
    %c0_i32 = arith.constant 0 : i32
    %c0_i32_0 = arith.constant 0 : i32
    return %arg0, %c0_i32 : i32, i32
  }
}

module attributes {stable_mosaic.version = 11 : i64} {
  func.func @qus_embedding_kernel(%arg0: i32, %arg1: memref<16x1xi32, #tpu.memory_space<vmem>>, %arg2: memref<128x128xbf16, #tpu.memory_space<vmem>>, %arg3: memref<1x128xf32, #tpu.memory_space<vmem>>, %arg4: memref<16x128xf32, #tpu.memory_space<vmem>>) attributes {dimension_semantics = [#tpu.dimension_semantics<parallel>], iteration_bounds = array<i64: 1>, scalar_prefetch = 0 : i64, scratch_operands = 0 : i64, tpu.core_type = #tpu.core_type<tc>, window_params = [{transform_indices = @transform_0, window_bounds = array<i64: 16, 1>}, {pipeline_mode = #tpu.pipeline_mode<synchronous>, transform_indices = @transform_1, window_bounds = array<i64: 128, 128>}, {pipeline_mode = #tpu.pipeline_mode<synchronous>, transform_indices = @transform_2, window_bounds = array<i64: 1, 128>}, {transform_indices = @transform_3, window_bounds = array<i64: 16, 128>}]} {
    %c0 = arith.constant 0 : index
    %c0_0 = arith.constant 0 : index
    %0 = vector.load %arg1[%c0, %c0_0] : memref<16x1xi32, #tpu.memory_space<vmem>>, vector<16x1xi32>
    %1 = tpu.iota {dimensions = array<i32: 1>} : vector<16x128xi32>
    %2 = vector.broadcast %0 : vector<16x1xi32> to vector<16x128xi32>
    %3 = arith.cmpi eq, %2, %1 : vector<16x128xi32>
    %4 = arith.extui %3 : vector<16x128xi1> to vector<16x128xi32>
    %5 = arith.sitofp %4 : vector<16x128xi32> to vector<16x128xf32>
    %6 = arith.truncf %5 : vector<16x128xf32> to vector<16x128xbf16>
    %c0_1 = arith.constant 0 : index
    %c0_2 = arith.constant 0 : index
    %7 = vector.load %arg2[%c0_1, %c0_2] : memref<128x128xbf16, #tpu.memory_space<vmem>>, vector<128x128xbf16>
    %cst = arith.constant dense<0.000000e+00> : vector<16x128xf32>
    %8 = tpu.matmul %6, %7, %cst {dimension_numbers = #tpu.dot_dimension_numbers<[1], [0], [0], [1], [0, 0, 1, 1], [], []>} : vector<16x128xbf16>, vector<128x128xbf16>, vector<16x128xf32> -> vector<16x128xf32>
    %c0_3 = arith.constant 0 : index
    %c0_4 = arith.constant 0 : index
    %9 = vector.load %arg3[%c0_3, %c0_4] : memref<1x128xf32, #tpu.memory_space<vmem>>, vector<1x128xf32>
    %10 = vector.broadcast %9 : vector<1x128xf32> to vector<16x128xf32>
    %11 = arith.addf %8, %10 : vector<16x128xf32>
    %c0_5 = arith.constant 0 : index
    %c0_6 = arith.constant 0 : index
    %12 = vector.load %arg4[%c0_5, %c0_6] : memref<16x128xf32, #tpu.memory_space<vmem>>, vector<16x128xf32>
    tpu.vector_store %arg4[%c0_5, %c0_6], %11 {strides = array<i32>} : memref<16x128xf32, #tpu.memory_space<vmem>>, vector<16x128xf32>,
    return
  }
  func.func @transform_0(%arg0: i32) -> (i32, i32) {
    %c0_i32 = arith.constant 0 : i32
    %c0_i32_0 = arith.constant 0 : i32
    return %arg0, %c0_i32 : i32, i32
  }
  func.func @transform_1(%arg0: i32) -> (i32, i32) {
    %c0_i32 = arith.constant 0 : i32
    %c0_i32_0 = arith.constant 0 : i32
    %c0_i32_1 = arith.constant 0 : i32
    return %c0_i32, %c0_i32_0 : i32, i32
  }
  func.func @transform_2(%arg0: i32) -> (i32, i32) {
    %c0_i32 = arith.constant 0 : i32
    %c0_i32_0 = arith.constant 0 : i32
    %c0_i32_1 = arith.constant 0 : i32
    return %c0_i32, %c0_i32_0 : i32, i32
  }
  func.func @transform_3(%arg0: i32) -> (i32, i32) {
    %c0_i32 = arith.constant 0 : i32
    %c0_i32_0 = arith.constant 0 : i32
    return %arg0, %c0_i32 : i32, i32
  }
}

</mosaic_0001>

<bundles_post_ra>
// kernel: tpu_custom_call.1
= control target key start
LH: loop header
LB: loop body
LE: loop exit
PB: predicated region body
PF: predicated region fallthrough
CT: control target
= control target key end

     0   :  { %8 = vsyncpa [#allocation3], 0  ;;  %s350_s0 = inlined_call_operand.vmem [shape: s32[16,1], index: 0, kind: input, shape index: {}]   ;;  %s351_s1 = inlined_call_operand.hbm [shape: bf16[128,128], index: 1, kind: input, shape index: {}]   ;;  %s352_s2 = inlined_call_operand.vmem [shape: f32[1,128], index: 2, kind: input, shape index: {}]   ;;  %s353_s3 = inlined_call_operand.hbm [shape: f32[16,128], index: 3, kind: output, shape index: {}]  }
   0x1   :  { %9 = vsyncpa [#allocation4], 0  ;;  %s287_s12 = smov [#allocation2]   ;;  %s239_s16 = scalar_lea.hbm %s351_s1, 1024 }
   0x2   :  { %s17_s13 = sshll.u32 %s287_s12, 4  ;;  %p240_p0 = scmp.ne.s32.totalorder %s351_s1, %s239_s16  ;;  %s18_s13 = int_to_ptr.vmem [resolvable:$true] %s17_s13 }
   0x3   :  { %p243_p1 = scmp.lt.u32.totalorder %s239_s16, %s351_s1 }
   0x5   :  { %p245_p2 = pnand %p243_p1, %p240_p0 }
   0x7   :  { %248 = shalt.err (!%p245_p2)
}
   0x8   :  { %s249_s21 = scalar_lea.vmem %s18_s13, 1024  ;;  %p254_p4 = scmp.lt.s32.totalorder %s18_s13, %s18_s13 }
   0x9   :  { %p250_p3 = scmp.ne.s32.totalorder %s18_s13, %s249_s21  ;;  %p255_p5 = scmp.lt.s32.totalorder %s249_s21, %s249_s21 }
   0xb   :  { %p256_p6 = por %p255_p5, %p254_p4 }
   0xd   :  { %p257_p7 = pnand %p256_p6, %p250_p3 }
   0xf   :  { %260 = shalt.err (!%p257_p7)
}
  0x10   :  { %s288_s22 = smov 64   ;;  %s289_s23 = smov 4  }
  0x11   :  { %23 = dma.hbm_to_vmem [thread:$0]  %s351_s1, 1024, %s18_s13, [#allocation3], %s288_s22, %s288_s22, %s289_s23  }
  0x12   :  { %283 = dma.done.wait [#allocation3], 1024  }
  0x13   :  { %284 = vsyncadd [#allocation3], 4294966272  ;;  %v290_v0 = vmov 0   ;;  %v291_v1 = vmov 0.0   ;;  %v30_v2 = vld [vmem:[%s350_s0] sm:$0xff]  ;;  %v231_v3 = vld [vmem:[#allocation2] sm:$0xff]   ;;  %v32_v12 = vlaneseq }
  0x14   :  { %230 = vset.pattern.permute.xlu0 %v290_v0  ;;  %200 = vmatprep.subr.bf16.mxu0 %v291_v1  ;;  %v31_v4 = vld [vmem:[%s350_s0 + $0x8] sm:$0xff]  ;;  %v232_v5 = vld [vmem:[#allocation2 + $0x8] sm:$0xff]   ;;  %vm292_vm0 = vmmov 0   ;;  %v234_v7 = vld [vmem:[#allocation2 + $0x18] sm:$0xff]   ;;  %v293_v16 = vmov 1.0|1.0  }
  0x15   :  { %35 = vperm.xlu0 %230, %v30_v2   ;;  %201 = vmatpush3.bf16.msra.mxu0 %v231_v3  ;;  %v233_v6 = vld [vmem:[#allocation2 + $0x10] sm:$0xff]   ;;  %v235_v8 = vld [vmem:[#allocation2 + $0x20] sm:$0xff]   ;;  %v236_v9 = vld [vmem:[#allocation2 + $0x28] sm:$0xff]   ;;  %v33_v14 = vand.u32 127, %v32_v12  ;;  %s294_s30 = smov [#allocation5]  }
  0x16   :  { %202 = vmatprep.subr.bf16.mxu0 %v291_v1  ;;  %216 = vmatprep.mubr.msk.bf16.mxu0 %vm292_vm0, %v291_v1  ;;  %v237_v10 = vld [vmem:[#allocation2 + $0x30] sm:$0xff]   ;;  %v238_v11 = vld [vmem:[#allocation2 + $0x38] sm:$0xff]   ;;  %v180_v17 = vld [vmem:[%s352_s2] ss:$0 sm:$0xff]  ;;  %s166_s4 = sshll.u32 %s294_s30, 4  ;;  %s167_s4 = int_to_ptr.vmem [resolvable:$true] %s166_s4 }
  0x17   :  { %s261_s5 = scalar_lea.vmem %s167_s4, 256  ;;  %p266_p9 = scmp.lt.s32.totalorder %s167_s4, %s167_s4 }
  0x18   :  { %p262_p8 = scmp.ne.s32.totalorder %s167_s4, %s261_s5  ;;  %p267_p10 = scmp.lt.s32.totalorder %s261_s5, %s261_s5 }
  0x19   :  { %38 = vperm.xlu0 %230, %v31_v4   ;;  %203 = vmatpush3.bf16.msra.mxu0 %v232_v5 }
  0x1a   :  { %204 = vmatprep.subr.bf16.mxu0 %v291_v1  ;;  %p268_p11 = por %p267_p10, %p266_p9 }
  0x1c   :  { %p269_p12 = pnand %p268_p11, %p262_p8 }
  0x1d   :  { %205 = vmatpush3.bf16.msra.mxu0 %v233_v6 }
  0x1e   :  { %206 = vmatprep.subr.bf16.mxu0 %v291_v1 }
  0x21   :  { %207 = vmatpush3.bf16.msra.mxu0 %v234_v7 }
  0x22   :  { %208 = vmatprep.subr.bf16.mxu0 %v291_v1 }
  0x25   :  { %209 = vmatpush3.bf16.msra.mxu0 %v235_v8 }
  0x26   :  { %210 = vmatprep.subr.bf16.mxu0 %v291_v1 }
  0x29   :  { %211 = vmatpush3.bf16.msra.mxu0 %v236_v9 }
  0x2a   :  { %212 = vmatprep.subr.bf16.mxu0 %v291_v1 }
  0x2d   :  { %213 = vmatpush3.bf16.msra.mxu0 %v237_v10 }
  0x2e   :  { %214 = vmatprep.subr.bf16.mxu0 %v291_v1 }
  0x31   :  { %215 = vmatpush3.bf16.msra.mxu0 %v238_v11 }
  0x94   :  { %v36_v13 = vpop.permute.xlu0 %35 }
  0x95   :  { %vm40_vm1 = vcmp.eq.s32.totalorder %v36_v13, %v33_v14 }
  0x98   :  { %v39_v15 = vpop.permute.xlu0 %38 }
  0x99   :  { %vm41_vm2 = vcmp.eq.s32.totalorder %v39_v15, %v33_v14 }
  0x9a   :  { %vm189_vm3 = vmpackc.low %vm41_vm2, %vm40_vm1 }
  0x9b   :  { %217 = vmatmul.mubr.msk.bf16.vlgmr.msra.gmra.mrb[0].mxu0 %vm189_vm3, %v293_v16 }
 0x16e   :  { %v152_v18 = vpop.f32.mrb[0].mxu0 }
 0x16f   :  { %v153_v19 = vadd.f32 %v180_v17, %v152_v18  ;;  %v218_v20 = vpop.f32.mrb[1].mxu0 }
 0x170   :  { %v155_v21 = vpop.f32.mrb[2].mxu0 }
 0x171   :  { %159 = vst [vmem:[#allocation5] sm:$0xff] %v153_v19  ;;  %v156_v22 = vadd.f32 %v180_v17, %v155_v21  ;;  %v219_v23 = vpop.f32.mrb[3].mxu0 }
 0x173   :  { %160 = vst [vmem:[#allocation5 + $0x8] sm:$0xff] %v156_v22 }
 0x174   :  { %272 = shalt.err (!%p269_p12)
}
 0x175   :  { %s273_s7 = scalar_lea.hbm %s353_s3, 256 }
 0x176   :  { %p274_p13 = scmp.ne.s32.totalorder %s353_s3, %s273_s7  ;;  %p277_p0 = scmp.lt.u32.totalorder %s273_s7, %s353_s3 }
 0x178   :  { %p279_p1 = pnand %p277_p0, %p274_p13 }
 0x17a   :  { %282 = shalt.err (!%p279_p1)
}
 0x17b   :  { %s295_s12 = smov 128   ;;  %s296_s13 = smov 8  }
 0x17c   :  { %172 = dma.vmem_to_hbm [thread:$0]  %s167_s4, 256, %s353_s3, [#allocation4], %s295_s12, %s295_s12, %s296_s13  }
 0x17d   :  { %285 = dma.done.wait [#allocation4], 256  }
 0x17e   :  { %286 = vsyncadd [#allocation4], 4294967040 }
 0x17f   :  { %176 = vsyncpa [#allocation3], 1 }
 0x180   :  { %177 = vsyncpa [#allocation4], 1 }

// kernel: tpu_custom_call.1
= control target key start
LH: loop header
LB: loop body
LE: loop exit
PB: predicated region body
PF: predicated region fallthrough
CT: control target
= control target key end

     0   :  { %8 = vsyncpa [#allocation3], 0  ;;  %s350_s0 = inlined_call_operand.vmem [shape: s32[16,1], index: 0, kind: input, shape index: {}]   ;;  %s351_s1 = inlined_call_operand.hbm [shape: bf16[128,128], index: 1, kind: input, shape index: {}]   ;;  %s352_s2 = inlined_call_operand.vmem [shape: f32[1,128], index: 2, kind: input, shape index: {}]   ;;  %s353_s3 = inlined_call_operand.hbm [shape: f32[16,128], index: 3, kind: output, shape index: {}]  }
   0x1   :  { %9 = vsyncpa [#allocation4], 0  ;;  %s287_s12 = smov [#allocation2]   ;;  %s239_s16 = scalar_lea.hbm %s351_s1, 1024 }
   0x2   :  { %s17_s13 = sshll.u32 %s287_s12, 4  ;;  %p240_p0 = scmp.ne.s32.totalorder %s351_s1, %s239_s16  ;;  %s18_s13 = int_to_ptr.vmem [resolvable:$true] %s17_s13 }
   0x3   :  { %p243_p1 = scmp.lt.u32.totalorder %s239_s16, %s351_s1 }
   0x5   :  { %p245_p2 = pnand %p243_p1, %p240_p0 }
   0x7   :  { %248 = shalt.err (!%p245_p2)
}
   0x8   :  { %s249_s21 = scalar_lea.vmem %s18_s13, 1024  ;;  %p254_p4 = scmp.lt.s32.totalorder %s18_s13, %s18_s13 }
   0x9   :  { %p250_p3 = scmp.ne.s32.totalorder %s18_s13, %s249_s21  ;;  %p255_p5 = scmp.lt.s32.totalorder %s249_s21, %s249_s21 }
   0xb   :  { %p256_p6 = por %p255_p5, %p254_p4 }
   0xd   :  { %p257_p7 = pnand %p256_p6, %p250_p3 }
   0xf   :  { %260 = shalt.err (!%p257_p7)
}
  0x10   :  { %s288_s22 = smov 64   ;;  %s289_s23 = smov 4  }
  0x11   :  { %23 = dma.hbm_to_vmem [thread:$0]  %s351_s1, 1024, %s18_s13, [#allocation3], %s288_s22, %s288_s22, %s289_s23  }
  0x12   :  { %283 = dma.done.wait [#allocation3], 1024  }
  0x13   :  { %284 = vsyncadd [#allocation3], 4294966272  ;;  %v290_v0 = vmov 0   ;;  %v291_v1 = vmov 0.0   ;;  %v30_v2 = vld [vmem:[%s350_s0] sm:$0xff]  ;;  %v231_v3 = vld [vmem:[#allocation2] sm:$0xff]   ;;  %v32_v12 = vlaneseq }
  0x14   :  { %230 = vset.pattern.permute.xlu0 %v290_v0  ;;  %200 = vmatprep.subr.bf16.mxu0 %v291_v1  ;;  %v31_v4 = vld [vmem:[%s350_s0 + $0x8] sm:$0xff]  ;;  %v232_v5 = vld [vmem:[#allocation2 + $0x8] sm:$0xff]   ;;  %vm292_vm0 = vmmov 0   ;;  %v234_v7 = vld [vmem:[#allocation2 + $0x18] sm:$0xff]   ;;  %v293_v16 = vmov 1.0|1.0  }
  0x15   :  { %35 = vperm.xlu0 %230, %v30_v2   ;;  %201 = vmatpush3.bf16.msra.mxu0 %v231_v3  ;;  %v233_v6 = vld [vmem:[#allocation2 + $0x10] sm:$0xff]   ;;  %v235_v8 = vld [vmem:[#allocation2 + $0x20] sm:$0xff]   ;;  %v236_v9 = vld [vmem:[#allocation2 + $0x28] sm:$0xff]   ;;  %v33_v14 = vand.u32 127, %v32_v12  ;;  %s294_s30 = smov [#allocation5]  }
  0x16   :  { %202 = vmatprep.subr.bf16.mxu0 %v291_v1  ;;  %216 = vmatprep.mubr.msk.bf16.mxu0 %vm292_vm0, %v291_v1  ;;  %v237_v10 = vld [vmem:[#allocation2 + $0x30] sm:$0xff]   ;;  %v238_v11 = vld [vmem:[#allocation2 + $0x38] sm:$0xff]   ;;  %v180_v17 = vld [vmem:[%s352_s2] ss:$0 sm:$0xff]  ;;  %s166_s4 = sshll.u32 %s294_s30, 4  ;;  %s167_s4 = int_to_ptr.vmem [resolvable:$true] %s166_s4 }
  0x17   :  { %s261_s5 = scalar_lea.vmem %s167_s4, 256  ;;  %p266_p9 = scmp.lt.s32.totalorder %s167_s4, %s167_s4 }
  0x18   :  { %p262_p8 = scmp.ne.s32.totalorder %s167_s4, %s261_s5  ;;  %p267_p10 = scmp.lt.s32.totalorder %s261_s5, %s261_s5 }
  0x19   :  { %38 = vperm.xlu0 %230, %v31_v4   ;;  %203 = vmatpush3.bf16.msra.mxu0 %v232_v5 }
  0x1a   :  { %204 = vmatprep.subr.bf16.mxu0 %v291_v1  ;;  %p268_p11 = por %p267_p10, %p266_p9 }
  0x1c   :  { %p269_p12 = pnand %p268_p11, %p262_p8 }
  0x1d   :  { %205 = vmatpush3.bf16.msra.mxu0 %v233_v6 }
  0x1e   :  { %206 = vmatprep.subr.bf16.mxu0 %v291_v1 }
  0x21   :  { %207 = vmatpush3.bf16.msra.mxu0 %v234_v7 }
  0x22   :  { %208 = vmatprep.subr.bf16.mxu0 %v291_v1 }
  0x25   :  { %209 = vmatpush3.bf16.msra.mxu0 %v235_v8 }
  0x26   :  { %210 = vmatprep.subr.bf16.mxu0 %v291_v1 }
  0x29   :  { %211 = vmatpush3.bf16.msra.mxu0 %v236_v9 }
  0x2a   :  { %212 = vmatprep.subr.bf16.mxu0 %v291_v1 }
  0x2d   :  { %213 = vmatpush3.bf16.msra.mxu0 %v237_v10 }
  0x2e   :  { %214 = vmatprep.subr.bf16.mxu0 %v291_v1 }
  0x31   :  { %215 = vmatpush3.bf16.msra.mxu0 %v238_v11 }
  0x94   :  { %v36_v13 = vpop.permute.xlu0 %35 }
  0x95   :  { %vm40_vm1 = vcmp.eq.s32.totalorder %v36_v13, %v33_v14 }
  0x98   :  { %v39_v15 = vpop.permute.xlu0 %38 }
  0x99   :  { %vm41_vm2 = vcmp.eq.s32.totalorder %v39_v15, %v33_v14 }
  0x9a   :  { %vm189_vm3 = vmpackc.low %vm41_vm2, %vm40_vm1 }
  0x9b   :  { %217 = vmatmul.mubr.msk.bf16.vlgmr.msra.gmra.mrb[0].mxu0 %vm189_vm3, %v293_v16 }
 0x16e   :  { %v152_v18 = vpop.f32.mrb[0].mxu0 }
 0x16f   :  { %v153_v19 = vadd.f32 %v180_v17, %v152_v18  ;;  %v218_v20 = vpop.f32.mrb[1].mxu0 }
 0x170   :  { %v155_v21 = vpop.f32.mrb[2].mxu0 }
 0x171   :  { %159 = vst [vmem:[#allocation5] sm:$0xff] %v153_v19  ;;  %v156_v22 = vadd.f32 %v180_v17, %v155_v21  ;;  %v219_v23 = vpop.f32.mrb[3].mxu0 }
 0x173   :  { %160 = vst [vmem:[#allocation5 + $0x8] sm:$0xff] %v156_v22 }
 0x174   :  { %272 = shalt.err (!%p269_p12)
}
 0x175   :  { %s273_s7 = scalar_lea.hbm %s353_s3, 256 }
 0x176   :  { %p274_p13 = scmp.ne.s32.totalorder %s353_s3, %s273_s7  ;;  %p277_p0 = scmp.lt.u32.totalorder %s273_s7, %s353_s3 }
 0x178   :  { %p279_p1 = pnand %p277_p0, %p274_p13 }
 0x17a   :  { %282 = shalt.err (!%p279_p1)
}
 0x17b   :  { %s295_s12 = smov 128   ;;  %s296_s13 = smov 8  }
 0x17c   :  { %172 = dma.vmem_to_hbm [thread:$0]  %s167_s4, 256, %s353_s3, [#allocation4], %s295_s12, %s295_s12, %s296_s13  }
 0x17d   :  { %285 = dma.done.wait [#allocation4], 256  }
 0x17e   :  { %286 = vsyncadd [#allocation4], 4294967040 }
 0x17f   :  { %176 = vsyncpa [#allocation3], 1 }
 0x180   :  { %177 = vsyncpa [#allocation4], 1 }

</bundles_post_ra>
